<compile_context>
chip_gen: v6e
topology: v6e:2x2x1
jax: 0.10.0
libtpu: 0.0.40
codegen_flags: <defaults>
</compile_context>

<pallas_src>
import math

import jax
import jax.numpy as jnp
from jax.experimental import pallas as pl
from jax.experimental.pallas import tpu as pltpu


def _scaled_res_skip_kernel(a_ref, up_ref, skip_ref, out_ref):
    # a_ref: (1, 1) f32 scalar in SMEM; up/skip/out: (block_rows, lane) VMEM tiles.
    # Cast `a` to the tensor dtype before the multiply: matches PyTorch's
    # 0-dim-parameter promotion (bf16 inputs stay bf16 end to end).
    a = a_ref[0, 0].astype(up_ref.dtype)
    out_ref[...] = up_ref[...] + a * skip_ref[...]


def _vmem_capacity_bytes():
    try:
        info = pltpu.get_tpu_info()
        cap = getattr(info, "vmem_capacity_bytes", None)
        if cap:
            return int(cap)
    except Exception:
        pass
    return 64 << 20  # unknown chip: assume the smaller (v7x-class) budget


def _tile_params():
    """Generation-aware (target_bytes_per_buffer, vmem_limit_bytes, min_grid_steps)."""
    vmem = _vmem_capacity_bytes()
    if vmem > (64 << 20):
        # v5e / v6e: 128 MiB physical VMEM, single TensorCore.
        # 8 MiB/buffer -> 3 arrays x 2 pipeline buffers = 48 MiB live.
        return 8 << 20, 64 << 20, 4
    # v7x: 64 MiB per TensorCore (32 MiB scoped default), 2 TCs per chip.
    # 4 MiB/buffer -> 24 MiB live; keep >= 8 steps so both TCs stream.
    return 4 << 20, 32 << 20, 8


def _run_tiles(a_arr, up2d, skip2d, *, donate_up):
    rows, lane = up2d.shape
    dtype = up2d.dtype
    itemsize = jnp.dtype(dtype).itemsize
    sublane = {1: 32, 2: 16}.get(itemsize, 8)
    row_bytes = lane * itemsize

    target_bytes, vmem_limit, desired_steps = _tile_params()
    block_rows = max(sublane, (target_bytes // row_bytes) // sublane * sublane)

    # Ensure enough balanced grid steps (v7x megacore / pipeline overlap) once
    # the array is big enough that >= desired_steps blocks of >= 256 KiB exist.
    min_split_rows = max(sublane, ((256 * 1024) // row_bytes) // sublane * sublane)
    if rows >= desired_steps * min_split_rows:
        cap = max(min_split_rows, (rows // desired_steps) // sublane * sublane)
        block_rows = min(block_rows, cap)

    block_rows = min(block_rows, rows)      # full-extent block is always legal
    grid_rows = pl.cdiv(rows, block_rows)   # partial last block is masked by Mosaic

    kwargs = {}
    if donate_up:
        # Call operands are (a, up2d, skip2d) -> alias xb_up (index 1) to output 0.
        # Net win only when the caller actually donates xb_up through jit.
        kwargs["input_output_aliases"] = {1: 0}

    return pl.pallas_call(
        _scaled_res_skip_kernel,
        out_shape=jax.ShapeDtypeStruct((rows, lane), dtype),
        grid=(grid_rows,),
        in_specs=[
            pl.BlockSpec(memory_space=pltpu.MemorySpace.SMEM),     # scalar a
            pl.BlockSpec((block_rows, lane), lambda i: (i, 0)),    # xb_up
            pl.BlockSpec((block_rows, lane), lambda i: (i, 0)),    # xb_skip
        ],
        out_specs=pl.BlockSpec((block_rows, lane), lambda i: (i, 0)),
        compiler_params=pltpu.CompilerParams(
            # TODO(synk): switch to pltpu.CORE_PARALLEL if profiling shows a
            # single v7x TensorCore active despite "parallel" semantics.
            dimension_semantics=("parallel",),
            vmem_limit_bytes=vmem_limit,
        ),
        **kwargs,
    )(a_arr, up2d, skip2d)


def scaled_res_skip(xb_up, xb_skip, a, *, donate_up=False):
    """xb_up, xb_skip: same shape/dtype (e.g. NCHW); a: learned scalar parameter."""
    assert xb_up.shape == xb_skip.shape
    assert xb_up.dtype == xb_skip.dtype
    orig_shape = xb_up.shape
    dtype = xb_up.dtype
    total = math.prod(orig_shape)

    a_arr = jnp.asarray(a, dtype=jnp.float32).reshape(1, 1)

    up_flat = xb_up.reshape(-1)     # contiguous reshape: free
    skip_flat = xb_skip.reshape(-1)

    # Largest lane width (multiple of 128) dividing the element count gives a
    # zero-copy 2-D reshape with no tail. Otherwise run the kernel over the
    # aligned prefix and handle the (< lane)-element tail outside the kernel.
    lane = None
    for cand in (2048, 1024, 512, 256, 128):
        if total % cand == 0:
            lane = cand
            break
    if lane is None:
        lane = 128
        for cand in (2048, 1024, 512, 256):
            if total // cand >= 8:
                lane = cand
                break

    main_len = (total // lane) * lane
    tail_len = total - main_len

    pieces = []
    if main_len:
        rows = main_len // lane
        if tail_len:
            # TODO(synk): the prefix slice still materializes a copy of each
            # input in XLA; a fully fused ragged path would pass the flat
            # arrays with memory_space=pl.ANY and do manual DMA in-kernel.
            up2d = up_flat[:main_len].reshape(rows, lane)
            skip2d = skip_flat[:main_len].reshape(rows, lane)
        else:
            up2d = up_flat.reshape(rows, lane)
            skip2d = skip_flat.reshape(rows, lane)
        out2d = _run_tiles(a_arr, up2d, skip2d, donate_up=donate_up)
        pieces.append(out2d.reshape(-1))
    if tail_len:
        a_t = a_arr[0, 0].astype(dtype)
        pieces.append(up_flat[main_len:] + a_t * skip_flat[main_len:])

    out_flat = pieces[0] if len(pieces) == 1 else jnp.concatenate(pieces)
    return out_flat.reshape(orig_shape)


if __name__ == "__main__":
    key = jax.random.PRNGKey(0)
    k1, k2, k3, k4 = jax.random.split(key, 4)

    # Shapes consistent with the module: batch=2, channels=4, spatial=16.
    N, C, H, W = 2, 4, 16, 16
    xb_up = jax.random.normal(k1, (N, C, H, W), dtype=jnp.float32)
    xb_skip = jax.random.normal(k2, (N, C, H, W), dtype=jnp.float32)

    # Parameter init matches nn.Parameter(torch.zeros(())).
    a_init = jnp.zeros((), dtype=jnp.float32)
    out = scaled_res_skip(xb_up, xb_skip, a_init)
    jax.block_until_ready(out)
    assert jnp.allclose(out, xb_up + a_init * xb_skip, atol=1e-6)

    # Nonzero scalar exercises the FMA path.
    a_nonzero = jnp.asarray(0.37, dtype=jnp.float32)
    out2 = scaled_res_skip(xb_up, xb_skip, a_nonzero)
    jax.block_until_ready(out2)
    assert jnp.allclose(out2, xb_up + a_nonzero * xb_skip, atol=1e-6)

    # Odd element count (not a multiple of 128) exercises the prefix+tail path
    # (no full-array pad or output slice anymore).
    xo_up = jax.random.normal(k3, (2, 3, 5, 7), dtype=jnp.float32)
    xo_skip = jax.random.normal(k4, (2, 3, 5, 7), dtype=jnp.float32)
    out3 = scaled_res_skip(xo_up, xo_skip, a_nonzero)
    jax.block_until_ready(out3)
    assert jnp.allclose(out3, xo_up + a_nonzero * xo_skip, atol=1e-6)

    print("KERNEL_OK")
</pallas_src>

<mosaic_0001>
module attributes {stable_mosaic.version = 11 : i64} {
  func.func @_scaled_res_skip_kernel(%arg0: i32, %arg1: memref<1x1xf32, #tpu.memory_space<smem>>, %arg2: memref<1x2048xf32, #tpu.memory_space<vmem>>, %arg3: memref<1x2048xf32, #tpu.memory_space<vmem>>, %arg4: memref<1x2048xf32, #tpu.memory_space<vmem>>) attributes {dimension_semantics = [#tpu.dimension_semantics<parallel>], iteration_bounds = array<i64: 1>, scalar_prefetch = 0 : i64, scratch_operands = 0 : i64, tpu.core_type = #tpu.core_type<tc>, window_params = [{transform_indices = @transform_0, window_bounds = array<i64: 1, 1>}, {transform_indices = @transform_1, window_bounds = array<i64: 1, 2048>}, {transform_indices = @transform_2, window_bounds = array<i64: 1, 2048>}, {transform_indices = @transform_3, window_bounds = array<i64: 1, 2048>}]} {
    %c0 = arith.constant 0 : index
    %c0_0 = arith.constant 0 : index
    %0 = memref.load %arg1[%c0, %c0_0] : memref<1x1xf32, #tpu.memory_space<smem>>
    %c0_1 = arith.constant 0 : index
    %c0_2 = arith.constant 0 : index
    %1 = vector.load %arg2[%c0_1, %c0_2] : memref<1x2048xf32, #tpu.memory_space<vmem>>, vector<1x2048xf32>
    %c0_3 = arith.constant 0 : index
    %c0_4 = arith.constant 0 : index
    %2 = vector.load %arg3[%c0_3, %c0_4] : memref<1x2048xf32, #tpu.memory_space<vmem>>, vector<1x2048xf32>
    %3 = vector.broadcast %0 : f32 to vector<1x2048xf32>
    %4 = arith.mulf %3, %2 : vector<1x2048xf32>
    %5 = arith.addf %1, %4 : vector<1x2048xf32>
    %c0_5 = arith.constant 0 : index
    %c0_6 = arith.constant 0 : index
    %6 = vector.load %arg4[%c0_5, %c0_6] : memref<1x2048xf32, #tpu.memory_space<vmem>>, vector<1x2048xf32>
    tpu.vector_store %arg4[%c0_5, %c0_6], %5 {strides = array<i32>} : memref<1x2048xf32, #tpu.memory_space<vmem>>, vector<1x2048xf32>,
    return
  }
  func.func @transform_0(%arg0: i32) -> (i32, i32) {
    %c0_i32 = arith.constant 0 : i32
    %c0_i32_0 = arith.constant 0 : i32
    %c0_i32_1 = arith.constant 0 : i32
    return %c0_i32, %c0_i32_0 : i32, i32
  }
  func.func @transform_1(%arg0: i32) -> (i32, i32) {
    %c0_i32 = arith.constant 0 : i32
    %c0_i32_0 = arith.constant 0 : i32
    return %arg0, %c0_i32 : i32, i32
  }
  func.func @transform_2(%arg0: i32) -> (i32, i32) {
    %c0_i32 = arith.constant 0 : i32
    %c0_i32_0 = arith.constant 0 : i32
    return %arg0, %c0_i32 : i32, i32
  }
  func.func @transform_3(%arg0: i32) -> (i32, i32) {
    %c0_i32 = arith.constant 0 : i32
    %c0_i32_0 = arith.constant 0 : i32
    return %arg0, %c0_i32 : i32, i32
  }
}

</mosaic_0001>

<bundles_post_ra>
// kernel: tpu_custom_call.1
= control target key start
LH: loop header
LB: loop body
LE: loop exit
PB: predicated region body
PF: predicated region fallthrough
CT: control target
= control target key end

     0   :  { %9 = vsyncpa [#allocation4], 0  ;;  %s172_s0 = inlined_call_operand.<no memory space> [shape: f32[1,1], index: 0, kind: input, shape index: {}]   ;;  %s173_s1 = inlined_call_operand.hbm [shape: f32[1,2048], index: 1, kind: input, shape index: {}]   ;;  %s174_s2 = inlined_call_operand.hbm [shape: f32[1,2048], index: 2, kind: input, shape index: {}]   ;;  %s175_s3 = inlined_call_operand.hbm [shape: f32[1,2048], index: 3, kind: output, shape index: {}]  }
   0x1   :  { %10 = vsyncpa [#allocation7], 0 }
   0x2   :  { %11 = vsyncpa [#allocation5], 0  ;;  %s137_s12 = smov [#allocation3]   ;;  %s138_s14 = smov [#allocation6]  }
   0x3   :  { %s20_s13 = sshll.u32 %s137_s12, 4  ;;  %s30_s15 = sshll.u32 %s138_s14, 4  ;;  %s21_s13 = int_to_ptr.vmem [resolvable:$true] %s20_s13  ;;  %s31_s15 = int_to_ptr.vmem [resolvable:$true] %s30_s15 }
   0x4   :  { %s79_s16 = scalar_lea.vmem %s21_s13, 256  ;;  %p84_p1 = scmp.lt.s32.totalorder %s21_s13, %s21_s13 }
   0x5   :  { %p80_p0 = scmp.ne.s32.totalorder %s21_s13, %s79_s16  ;;  %p85_p2 = scmp.lt.s32.totalorder %s79_s16, %s79_s16 }
   0x7   :  { %p86_p3 = por %p85_p2, %p84_p1 }
   0x9   :  { %p87_p4 = pnand %p86_p3, %p80_p0 }
   0xb   :  { %90 = shalt.err (!%p87_p4)
}
   0xc   :  { %23 = dma.hbm_to_vmem [thread:$0]  %s173_s1, 256, %s21_s13, [#allocation4]  }
   0xd   :  { %s99_s19 = scalar_lea.vmem %s31_s15, 256  ;;  %p104_p6 = scmp.lt.s32.totalorder %s31_s15, %s31_s15 }
   0xe   :  { %p100_p5 = scmp.ne.s32.totalorder %s31_s15, %s99_s19  ;;  %p105_p7 = scmp.lt.s32.totalorder %s99_s19, %s99_s19 }
  0x10   :  { %p106_p8 = por %p105_p7, %p104_p6 }
  0x12   :  { %p107_p9 = pnand %p106_p8, %p100_p5 }
  0x14   :  { %110 = shalt.err (!%p107_p9)
}
  0x15   :  { %33 = dma.hbm_to_vmem [thread:$0]  %s174_s2, 256, %s31_s15, [#allocation7]  }
  0x16   :  { %131 = dma.done.wait [#allocation4], 256  }
  0x17   :  { %132 = vsyncadd [#allocation4], 4294967040 }
  0x18   :  { %133 = dma.done.wait [#allocation7], 256  }
  0x19   :  { %134 = vsyncadd [#allocation7], 4294967040  ;;  %v45_v0 = vstv %s172_s0  ;;  %v41_v1 = vld [vmem:[#allocation3] sm:$0xff]  ;;  %v43_v2 = vld [vmem:[#allocation6] sm:$0xff]  ;;  %s139_s1 = smov [#allocation8]  }
  0x1a   :  { %v46_v3 = vmul.f32 %v45_v0, %v43_v2  ;;  %v42_v4 = vld [vmem:[#allocation3 + $0x8] sm:$0xff]  ;;  %v44_v5 = vld [vmem:[#allocation6 + $0x8] sm:$0xff]  ;;  %s58_s24 = sshll.u32 %s139_s1, 4  ;;  %s59_s24 = int_to_ptr.vmem [resolvable:$true] %s58_s24 }
  0x1b   :  { %v47_v6 = vmul.f32 %v45_v0, %v44_v5  ;;  %s111_s2 = scalar_lea.vmem %s59_s24, 256  ;;  %p116_p11 = scmp.lt.s32.totalorder %s59_s24, %s59_s24 }
  0x1c   :  { %v48_v7 = vadd.f32 %v46_v3, %v41_v1  ;;  %p112_p10 = scmp.ne.s32.totalorder %s59_s24, %s111_s2  ;;  %p117_p12 = scmp.lt.s32.totalorder %s111_s2, %s111_s2 }
  0x1d   :  { %v49_v8 = vadd.f32 %v47_v6, %v42_v4 }
  0x1e   :  { %50 = vst [vmem:[#allocation8] sm:$0xff] %v48_v7  ;;  %p118_p13 = por %p117_p12, %p116_p11 }
  0x1f   :  { %51 = vst [vmem:[#allocation8 + $0x8] sm:$0xff] %v49_v8 }
  0x20   :  { %p119_p0 = pnand %p118_p13, %p112_p10 }
  0x22   :  { %122 = shalt.err (!%p119_p0)
}
  0x23   :  { %61 = dma.vmem_to_hbm [thread:$0]  %s59_s24, 256, %s175_s3, [#allocation5]  }
  0x24   :  { %135 = dma.done.wait [#allocation5], 256  }
  0x25   :  { %136 = vsyncadd [#allocation5], 4294967040 }
  0x26   :  { %65 = vsyncpa [#allocation4], 1 }
  0x27   :  { %66 = vsyncpa [#allocation7], 1 }
  0x28   :  { %67 = vsyncpa [#allocation5], 1 }

</bundles_post_ra>
